<compile_context>
chip_gen: v5e
topology: v5e:2x2
jax: 0.10.0
libtpu: 0.0.40
codegen_flags: <defaults>
</compile_context>

<pallas_src>
import functools

import jax
import jax.numpy as jnp
import numpy as np
from jax import lax
from jax.experimental import pallas as pl
from jax.experimental.pallas import tpu as pltpu


def pinn_kernel(x_ref, wi_ref, bi_ref, wh_ref, bh_ref, wo_ref, bo_ref, o_ref,
                *, matmul_dtype):
    n_in = wi_ref.shape[1]
    n_out = wo_ref.shape[1]

    # ---- Input layer + tanh ----------------------------------------------------
    if n_in == 1:
        # K = 1 matmul is just an outer product: do it on the VPU, skip the MXU.
        pre = wi_ref[...] * x_ref[...]                       # (H,1)*(1,Bb) -> (H,Bb)
    else:
        pre = jnp.dot(wi_ref[...].astype(matmul_dtype),
                      x_ref[...].astype(matmul_dtype),
                      preferred_element_type=jnp.float32)
    h = jnp.tanh(pre + bi_ref[...])                          # (H, Bb), f32 (EUP tanh)

    # ---- Hidden Linear+Tanh blocks (n_layers - 1), statically unrolled ---------
    for l in range(wh_ref.shape[0]):
        w = wh_ref[l].astype(matmul_dtype)                   # (H, H), PyTorch [out, in]
        h = jnp.tanh(
            jnp.dot(w, h.astype(matmul_dtype),
                    preferred_element_type=jnp.float32)
            + bh_ref[l])                                     # bias column (H, 1)

    # ---- Output layer (no activation) -------------------------------------------
    if n_out == 1:
        # N = 1 matmul -> elementwise multiply + sublane reduce (XLU); lane-dense.
        y = jnp.sum(h * wo_ref[...], axis=0, keepdims=True) + bo_ref[...]
    else:
        y = lax.dot_general(wo_ref[...].astype(matmul_dtype),
                            h.astype(matmul_dtype),
                            dimension_numbers=(((0,), (0,)), ((), ())),
                            preferred_element_type=jnp.float32) + bo_ref[...]
    o_ref[...] = y.astype(o_ref.dtype)                       # (n_out, Bb) lane-dense store


def pinn_forward(x, params, *, max_block_b=2048, use_bf16_matmul=False):
    """PINN MLP forward as one Pallas kernel, tiled over the (padded) batch.

    x      : (B, n_in) float32
    params : (wi, bi, wh, bh, wo, bo) with
             wi (H, n_in), bi (H, 1)           [PyTorch [out, in]; bias as column]
             wh (L-1, H, H), bh (L-1, H, 1)    [PyTorch [out, in] per layer]
             wo (H, n_out), bo (n_out, 1)      [[in, out]; bias as column]
    returns: (B, n_out) float32
    """
    wi, bi, wh, bh, wo, bo = params
    B, n_in = x.shape
    n_hidden = wi.shape[0]
    n_out = wo.shape[1]
    nhl = wh.shape[0]
    assert nhl >= 1, "this kernel assumes n_layers >= 2 (at least one hidden block)"

    # Pad batch to a multiple of 128 so every tile is lane-dense (unmasked vst),
    # then pick the largest lane-dense tile dividing b_pad that still leaves
    # >= 2 grid steps when possible (megacore sharding on v7x via "parallel").
    b_pad = ((B + 127) // 128) * 128
    block_b = min(b_pad, max_block_b if b_pad % max_block_b == 0 else 128)
    cap = min(max_block_b, max(b_pad // 2, 128))
    for cand in range(128, cap + 1, 128):
        if b_pad % cand == 0:
            block_b = cand
    grid = (b_pad // block_b,)

    # Wrapper-side layout plumbing only: transpose + zero-pad the batch (tiny).
    x_t = jnp.zeros((n_in, b_pad), x.dtype).at[:, :B].set(x.T)

    matmul_dtype = jnp.bfloat16 if use_bf16_matmul else jnp.float32
    kernel = functools.partial(pinn_kernel, matmul_dtype=matmul_dtype)

    flops = 2 * b_pad * n_hidden * (n_in + n_hidden * nhl + n_out)
    transcendentals = b_pad * n_hidden * (nhl + 1)
    bytes_accessed = 4 * (b_pad * (n_in + n_out)
                          + n_hidden * (n_in + 1)
                          + nhl * (n_hidden * n_hidden + n_hidden)
                          + n_hidden * n_out + n_out)

    out_t = pl.pallas_call(
        kernel,
        out_shape=jax.ShapeDtypeStruct((n_out, b_pad), jnp.float32),
        grid_spec=pltpu.PrefetchScalarGridSpec(
            num_scalar_prefetch=0,
            grid=grid,
            in_specs=[
                pl.BlockSpec((n_in, block_b), lambda i: (0, i)),               # x^T tile
                pl.BlockSpec((n_hidden, n_in), lambda i: (0, 0)),              # W_in [out, in]
                pl.BlockSpec((n_hidden, 1), lambda i: (0, 0)),                 # b_in column
                pl.BlockSpec((nhl, n_hidden, n_hidden), lambda i: (0, 0, 0)),  # W_hidden stack
                pl.BlockSpec((nhl, n_hidden, 1), lambda i: (0, 0, 0)),         # b_hidden stack
                pl.BlockSpec((n_hidden, n_out), lambda i: (0, 0)),             # W_out [in, out]
                pl.BlockSpec((n_out, 1), lambda i: (0, 0)),                    # b_out column
            ],
            out_specs=pl.BlockSpec((n_out, block_b), lambda i: (0, i)),        # lane-dense y^T
        ),
        compiler_params=pltpu.CompilerParams(
            dimension_semantics=("parallel",),
        ),
        cost_estimate=pl.CostEstimate(
            flops=flops,
            transcendentals=transcendentals,
            bytes_accessed=bytes_accessed,
        ),
    )(x_t, wi, bi, wh, bh, wo, bo)

    return out_t[:, :B].T


def init_params(key, n_input, n_output, n_hidden, n_layers):
    """PyTorch nn.Linear-style init (uniform +/- 1/sqrt(fan_in)) in kernel layout."""
    n_hidden_layers = n_layers - 1
    ks = jax.random.split(key, 2 * (n_hidden_layers + 2))

    def lin(kw, kb, fan_in, fan_out):
        bound = 1.0 / np.sqrt(fan_in)
        w = jax.random.uniform(kw, (fan_out, fan_in), jnp.float32, -bound, bound)
        b = jax.random.uniform(kb, (fan_out, 1), jnp.float32, -bound, bound)
        return w, b

    wi, bi = lin(ks[0], ks[1], n_input, n_hidden)            # (H, n_in), (H, 1)

    wh_list, bh_list = [], []
    for l in range(n_hidden_layers):
        w, b = lin(ks[2 + 2 * l], ks[3 + 2 * l], n_hidden, n_hidden)
        wh_list.append(w)
        bh_list.append(b)
    wh = jnp.stack(wh_list, axis=0)                          # (L-1, H, H)
    bh = jnp.stack(bh_list, axis=0)                          # (L-1, H, 1)

    wo_pt, bo = lin(ks[2 + 2 * n_hidden_layers], ks[3 + 2 * n_hidden_layers],
                    n_hidden, n_output)                      # (n_out, H), (n_out, 1)
    wo = wo_pt.T                                             # stored as (H, n_out)
    return wi, bi, wh, bh, wo, bo


def pinn_reference(x, params):
    """Pure-JAX reference matching the PyTorch PINN.forward semantics."""
    wi, bi, wh, bh, wo, bo = params
    h = jnp.tanh(x @ wi.T + bi[:, 0])
    for l in range(wh.shape[0]):
        h = jnp.tanh(h @ wh[l].T + bh[l][:, 0])
    return h @ wo + bo.T


if __name__ == "__main__":
    # Simple harmonic oscillator PINN: input t (1-D), output x(t) (1-D).
    n_input, n_output, n_hidden, n_layers = 1, 1, 32, 3
    batch = 300   # deliberately not a multiple of the tile: exercises batch padding

    key = jax.random.PRNGKey(0)
    kx, kp = jax.random.split(key)
    x = jax.random.uniform(kx, (batch, n_input), jnp.float32, 0.0, 1.0)
    params = init_params(kp, n_input, n_output, n_hidden, n_layers)

    ref = pinn_reference(x, params)

    # f32 path (exact fidelity to the PyTorch module).
    out = jax.block_until_ready(pinn_forward(x, params))
    np.testing.assert_allclose(np.asarray(out), np.asarray(ref), rtol=1e-5, atol=1e-5)

    # bf16 matmul operands (v6e/v7x MXU fast path; tanh/bias adds stay f32 for v5e).
    out_bf16 = jax.block_until_ready(pinn_forward(x, params, use_bf16_matmul=True))
    np.testing.assert_allclose(np.asarray(out_bf16), np.asarray(ref), rtol=5e-2, atol=5e-2)

    print("KERNEL_OK")
</pallas_src>

<mosaic_0001>
module attributes {stable_mosaic.version = 11 : i64} {
  func.func @pinn_kernel(%arg0: i32, %arg1: memref<1x128xf32, #tpu.memory_space<vmem>>, %arg2: memref<32x1xf32, #tpu.memory_space<vmem>>, %arg3: memref<32x1xf32, #tpu.memory_space<vmem>>, %arg4: memref<2x32x32xf32, #tpu.memory_space<vmem>>, %arg5: memref<2x32x1xf32, #tpu.memory_space<vmem>>, %arg6: memref<32x1xf32, #tpu.memory_space<vmem>>, %arg7: memref<1x1xf32, #tpu.memory_space<vmem>>, %arg8: memref<1x128xf32, #tpu.memory_space<vmem>>) attributes {dimension_semantics = [#tpu.dimension_semantics<parallel>], iteration_bounds = array<i64: 3>, scalar_prefetch = 0 : i64, scratch_operands = 0 : i64, tpu.core_type = #tpu.core_type<tc>, window_params = [{transform_indices = @transform_0, window_bounds = array<i64: 1, 128>}, {pipeline_mode = #tpu.pipeline_mode<synchronous>, transform_indices = @transform_1, window_bounds = array<i64: 32, 1>}, {pipeline_mode = #tpu.pipeline_mode<synchronous>, transform_indices = @transform_2, window_bounds = array<i64: 32, 1>}, {pipeline_mode = #tpu.pipeline_mode<synchronous>, transform_indices = @transform_3, window_bounds = array<i64: 2, 32, 32>}, {pipeline_mode = #tpu.pipeline_mode<synchronous>, transform_indices = @transform_4, window_bounds = array<i64: 2, 32, 1>}, {pipeline_mode = #tpu.pipeline_mode<synchronous>, transform_indices = @transform_5, window_bounds = array<i64: 32, 1>}, {pipeline_mode = #tpu.pipeline_mode<synchronous>, transform_indices = @transform_6, window_bounds = array<i64: 1, 1>}, {transform_indices = @transform_7, window_bounds = array<i64: 1, 128>}]} {
    %c0 = arith.constant 0 : index
    %c0_0 = arith.constant 0 : index
    %0 = vector.load %arg2[%c0, %c0_0] : memref<32x1xf32, #tpu.memory_space<vmem>>, vector<32x1xf32>
    %c0_1 = arith.constant 0 : index
    %c0_2 = arith.constant 0 : index
    %1 = vector.load %arg1[%c0_1, %c0_2] : memref<1x128xf32, #tpu.memory_space<vmem>>, vector<1x128xf32>
    %2 = vector.broadcast %0 : vector<32x1xf32> to vector<32x128xf32>
    %3 = vector.broadcast %1 : vector<1x128xf32> to vector<32x128xf32>
    %4 = arith.mulf %2, %3 : vector<32x128xf32>
    %c0_3 = arith.constant 0 : index
    %c0_4 = arith.constant 0 : index
    %5 = vector.load %arg3[%c0_3, %c0_4] : memref<32x1xf32, #tpu.memory_space<vmem>>, vector<32x1xf32>
    %6 = vector.broadcast %5 : vector<32x1xf32> to vector<32x128xf32>
    %7 = arith.addf %4, %6 : vector<32x128xf32>
    %8 = math.tanh %7 : vector<32x128xf32>
    %c0_5 = arith.constant 0 : index
    %c0_6 = arith.constant 0 : index
    %c0_7 = arith.constant 0 : index
    %9 = vector.load %arg4[%c0_5, %c0_6, %c0_7] : memref<2x32x32xf32, #tpu.memory_space<vmem>>, vector<1x32x32xf32>
    %10 = vector.shape_cast %9 : vector<1x32x32xf32> to vector<32x32xf32>
    %cst = arith.constant dense<0.000000e+00> : vector<32x128xf32>
    %11 = tpu.matmul %10, %8, %cst {dimension_numbers = #tpu.dot_dimension_numbers<[1], [0], [0], [1], [0, 0, 1, 1], [], []>} : vector<32x32xf32>, vector<32x128xf32>, vector<32x128xf32> -> vector<32x128xf32>
    %c0_8 = arith.constant 0 : index
    %c0_9 = arith.constant 0 : index
    %c0_10 = arith.constant 0 : index
    %12 = vector.load %arg5[%c0_8, %c0_9, %c0_10] : memref<2x32x1xf32, #tpu.memory_space<vmem>>, vector<1x32x1xf32>
    %13 = vector.shape_cast %12 : vector<1x32x1xf32> to vector<32x1xf32>
    %14 = vector.broadcast %13 : vector<32x1xf32> to vector<32x128xf32>
    %15 = arith.addf %11, %14 : vector<32x128xf32>
    %16 = math.tanh %15 : vector<32x128xf32>
    %c1 = arith.constant 1 : index
    %c0_11 = arith.constant 0 : index
    %c0_12 = arith.constant 0 : index
    %17 = vector.load %arg4[%c1, %c0_11, %c0_12] : memref<2x32x32xf32, #tpu.memory_space<vmem>>, vector<1x32x32xf32>
    %18 = vector.shape_cast %17 : vector<1x32x32xf32> to vector<32x32xf32>
    %cst_13 = arith.constant dense<0.000000e+00> : vector<32x128xf32>
    %19 = tpu.matmul %18, %16, %cst_13 {dimension_numbers = #tpu.dot_dimension_numbers<[1], [0], [0], [1], [0, 0, 1, 1], [], []>} : vector<32x32xf32>, vector<32x128xf32>, vector<32x128xf32> -> vector<32x128xf32>
    %c1_14 = arith.constant 1 : index
    %c0_15 = arith.constant 0 : index
    %c0_16 = arith.constant 0 : index
    %20 = vector.load %arg5[%c1_14, %c0_15, %c0_16] : memref<2x32x1xf32, #tpu.memory_space<vmem>>, vector<1x32x1xf32>
    %21 = vector.shape_cast %20 : vector<1x32x1xf32> to vector<32x1xf32>
    %22 = vector.broadcast %21 : vector<32x1xf32> to vector<32x128xf32>
    %23 = arith.addf %19, %22 : vector<32x128xf32>
    %24 = math.tanh %23 : vector<32x128xf32>
    %c0_17 = arith.constant 0 : index
    %c0_18 = arith.constant 0 : index
    %25 = vector.load %arg6[%c0_17, %c0_18] : memref<32x1xf32, #tpu.memory_space<vmem>>, vector<32x1xf32>
    %26 = vector.broadcast %25 : vector<32x1xf32> to vector<32x128xf32>
    %27 = arith.mulf %24, %26 : vector<32x128xf32>
    %cst_19 = arith.constant dense<0.000000e+00> : vector<128xf32>
    %28 = vector.multi_reduction <add>, %27, %cst_19 [0] : vector<32x128xf32> to vector<128xf32>
    %29 = vector.shape_cast %28 : vector<128xf32> to vector<1x128xf32>
    %c0_20 = arith.constant 0 : index
    %c0_21 = arith.constant 0 : index
    %30 = vector.load %arg7[%c0_20, %c0_21] : memref<1x1xf32, #tpu.memory_space<vmem>>, vector<1x1xf32>
    %31 = vector.broadcast %30 : vector<1x1xf32> to vector<1x128xf32>
    %32 = arith.addf %29, %31 : vector<1x128xf32>
    %c0_22 = arith.constant 0 : index
    %c0_23 = arith.constant 0 : index
    %33 = vector.load %arg8[%c0_22, %c0_23] : memref<1x128xf32, #tpu.memory_space<vmem>>, vector<1x128xf32>
    tpu.vector_store %arg8[%c0_22, %c0_23], %32 {strides = array<i32>} : memref<1x128xf32, #tpu.memory_space<vmem>>, vector<1x128xf32>,
    return
  }
  func.func @transform_0(%arg0: i32) -> (i32, i32) {
    %c0_i32 = arith.constant 0 : i32
    %c0_i32_0 = arith.constant 0 : i32
    return %c0_i32, %arg0 : i32, i32
  }
  func.func @transform_1(%arg0: i32) -> (i32, i32) {
    %c0_i32 = arith.constant 0 : i32
    %c0_i32_0 = arith.constant 0 : i32
    %c0_i32_1 = arith.constant 0 : i32
    return %c0_i32, %c0_i32_0 : i32, i32
  }
  func.func @transform_2(%arg0: i32) -> (i32, i32) {
    %c0_i32 = arith.constant 0 : i32
    %c0_i32_0 = arith.constant 0 : i32
    %c0_i32_1 = arith.constant 0 : i32
    return %c0_i32, %c0_i32_0 : i32, i32
  }
  func.func @transform_3(%arg0: i32) -> (i32, i32, i32) {
    %c0_i32 = arith.constant 0 : i32
    %c0_i32_0 = arith.constant 0 : i32
    %c0_i32_1 = arith.constant 0 : i32
    %c0_i32_2 = arith.constant 0 : i32
    return %c0_i32, %c0_i32_0, %c0_i32_1 : i32, i32, i32
  }
  func.func @transform_4(%arg0: i32) -> (i32, i32, i32) {
    %c0_i32 = arith.constant 0 : i32
    %c0_i32_0 = arith.constant 0 : i32
    %c0_i32_1 = arith.constant 0 : i32
    %c0_i32_2 = arith.constant 0 : i32
    return %c0_i32, %c0_i32_0, %c0_i32_1 : i32, i32, i32
  }
  func.func @transform_5(%arg0: i32) -> (i32, i32) {
    %c0_i32 = arith.constant 0 : i32
    %c0_i32_0 = arith.constant 0 : i32
    %c0_i32_1 = arith.constant 0 : i32
    return %c0_i32, %c0_i32_0 : i32, i32
  }
  func.func @transform_6(%arg0: i32) -> (i32, i32) {
    %c0_i32 = arith.constant 0 : i32
    %c0_i32_0 = arith.constant 0 : i32
    %c0_i32_1 = arith.constant 0 : i32
    return %c0_i32, %c0_i32_0 : i32, i32
  }
  func.func @transform_7(%arg0: i32) -> (i32, i32) {
    %c0_i32 = arith.constant 0 : i32
    %c0_i32_0 = arith.constant 0 : i32
    return %c0_i32, %arg0 : i32, i32
  }
}

</mosaic_0001>

<bundles_post_ra>
// kernel: tpu_custom_call.1
= control target key start
LH: loop header
LB: loop body
LE: loop exit
PB: predicated region body
PF: predicated region fallthrough
CT: control target
= control target key end

     0   :  { %s987_s0 = inlined_call_operand.vmem [shape: f32[1,384], index: 0, kind: input, shape index: {}]   ;;  %s988_s1 = inlined_call_operand.vmem [shape: f32[32,1], index: 1, kind: input, shape index: {}]   ;;  %s989_s2 = inlined_call_operand.vmem [shape: f32[32,1], index: 2, kind: input, shape index: {}]   ;;  %s990_s3 = inlined_call_operand.vmem [shape: f32[2,32,32], index: 3, kind: input, shape index: {}]   ;;  %s991_s4 = inlined_call_operand.vmem [shape: f32[2,32,1], index: 4, kind: input, shape index: {}]   ;;  %s992_s5 = inlined_call_operand.vmem [shape: f32[32,1], index: 5, kind: input, shape index: {}]   ;;  %s993_s6 = inlined_call_operand.<no memory space> [shape: f32[1,1], index: 6, kind: input, shape index: {}]   ;;  %s994_s7 = inlined_call_operand.hbm [shape: f32[1,384], index: 7, kind: output, shape index: {}]  }
   0x1   :  { %v12_v0 = vstv %s993_s6 }
   0x2   :  { %13 = vst [vmem:[#allocation2] sm:$0x1] %v12_v0 }
   0x3   :  { %14 = vsyncpa [#allocation4], 0 }
   0x4   :  { %16 = vsyncpa [#allocation4 + $0x1], 0  ;;  %s802_s26 = smov 0   ;;  %s804_s27 = smov 0  }
   0x5   :  { %s806_s28 = smov 0   ;;  %s808_s29 = smov 0  }
   0x6 LB: > { %s823_s6 = sadd.s32 4294967295, %s756_s29   ;;  %s596_s30 = sadd.s32 4294967294, %s756_s29   ;;  %s756_s29 = sphi %s808_s29, %s1000_s29   ;;  %s752_s28 = sphi %s806_s28, %s999_s28   ;;  %s748_s27 = sphi %s804_s27, %s998_s27   ;;  %s744_s26 = sphi %s802_s26, %s997_s26  }
   0x7   : > { %s827_s8 = sadd.s32 1, %s756_s29   ;;  %s181_s9 = sadd.s32 1, %s752_s28 }
   0x8   : > { %s178_s10 = ssub.s32 %s756_s29, %s827_s8  ;;  %p191_p0 = scmp.ne.s32.totalorder %s752_s28, %s748_s27 }
   0x9   : > { %p179_p1 = scmp.eq.s32.totalorder %s178_s10, 0  ;;  %p192_p2 = scmp.eq.s32.totalorder %s823_s6, 2 }
   0xa   : > { %p197_p3 = scmp.ne.s32.totalorder %s748_s27, %s744_s26  ;;  %p198_p4 = scmp.eq.s32.totalorder %s596_s30, 2 }
   0xb   : > { %s838_s11 = scalar_select %p179_p1, %s752_s28, %s181_s9  }
   0xc   : > { %p840_p5 = por %p192_p2, %p191_p0  ;;  %p844_p6 = por %p198_p4, %p197_p3 }
   0xd   : > { %p599_p7 = scmp.ge.s32.totalorder %s756_s29, 1  ;;  %p240_p8 = scmp.lt.s32.totalorder %s756_s29, 4 }
   0xf   : > { %p241_p9 = pnand %p599_p7, %p240_p8 }
  0x10   : > { %p269_p10 = scmp.lt.s32.totalorder (!%p241_p9), %s823_s6, 2  ;;  %s540_s22 = scalar_lea.hbm (!%p241_p9), %s994_s7, %s823_s6 }
  0x11   : > { %244 = sbr.rel (%p241_p9) target bundleno = 494 (0x1ee), region = 48  ;;  %s544_s30 = sshll.u32 (!%p241_p9), %s540_s22, 4  ;;  %s545_s30 = int_to_ptr.hbm [resolvable:$true] %s544_s30 }
  0x12   : > { %s708_s10 = sshra.s32 (!%p241_p9), %s545_s30, 4  ;;  %s714_s16 = scalar_lea.hbm (!%p241_p9), %s994_s7, 3  ;;  %s709_s10 = int_to_ptr.hbm [resolvable:$true] %s708_s10 }
  0x13   : > { %s710_s14 = scalar_lea.hbm (!%p241_p9), %s709_s10, 1  ;;  %p715_p0 = scmp.lt.s32.totalorder (!%p241_p9), %s709_s10, %s994_s7 }
  0x14   : > { %p711_p11 = scmp.ne.s32.totalorder (!%p241_p9), %s709_s10, %s710_s14  ;;  %p716_p1 = scmp.lt.s32.totalorder (!%p241_p9), %s714_s16, %s710_s14 }
  0x16   : > { %v306_v1 = vld [vmem:[%s989_s2 + $0x10] sm:$0xff]  ;;  %v307_v2 = vld [vmem:[%s989_s2 + $0x18] sm:$0xff]  ;;  %v758_v4 = vmov 0   ;;  %s861_s20 = scalar_select %p269_p10, %s823_s6, 2  ;;  %v272_v5 = vld [vmem:[%s988_s1] sm:$0xff]  ;;  %vm364_vm0 = vcmask 261120  }
  0x17   : > { %v275_v3 = vld [vmem:[%s988_s1 + $0x18] sm:$0xff]  ;;  %668 = vset.pattern.permute.xlu2 %v758_v4  ;;  %667 = vset.pattern.permute.xlu1 %v758_v4  ;;  %v274_v6 = vld [vmem:[%s988_s1 + $0x10] sm:$0xff]  ;;  %v273_v7 = vld [vmem:[%s988_s1 + $0x8] sm:$0xff]  ;;  %p712_p12 = pnand %p711_p11, %p840_p5  ;;  %p717_p2 = por %p716_p1, %p715_p0 }
  0x18   : > { %666 = vset.pattern.permute.xlu0 %v758_v4  ;;  %320 = vperm.xlu2 %668, %v306_v1   ;;  %s271_s23 = scalar_lea.vmem %s987_s0, %s861_s20  ;;  %v343_v8 = vld [vmem:[%s991_s4 + $0x18] sm:$0xff]  ;;  %v305_v9 = vld [vmem:[%s989_s2 + $0x8] sm:$0xff]  ;;  %v304_v10 = vld [vmem:[%s989_s2] sm:$0xff] }
  0x19   : > { %325 = vperm.xlu1 %667, %v307_v2   ;;  %294 = vperm.xlu0 %666, %v275_v3   ;;  %v340_v11 = vld [vmem:[%s991_s4] sm:$0xff]  ;;  %v342_v12 = vld [vmem:[%s991_s4 + $0x10] sm:$0xff]  ;;  %v341_v13 = vld [vmem:[%s991_s4 + $0x8] sm:$0xff]  ;;  %p713_p13 = pneg %p712_p12 }
  0x1a   : > { %v610_v14 = vld [vmem:[%s991_s4 + $0x30] sm:$0xff]  ;;  %v608_v15 = vld [vmem:[%s991_s4 + $0x20] sm:$0xff]  ;;  %v609_v16 = vld [vmem:[%s991_s4 + $0x28] sm:$0xff] }
  0x1b   : > { %v486_v17 = vld [vmem:[%s992_s5 + $0x8] sm:$0xff]  ;;  %v611_v18 = vld [vmem:[%s991_s4 + $0x38] sm:$0xff]  ;;  %v485_v19 = vld [vmem:[%s992_s5] sm:$0xff]  ;;  %p718_p3 = pnand %p717_p2, %p713_p13 }
  0x1c   : > { %v522_v20 = vld [vmem:[#allocation2] sm:$0x1]  ;;  %v487_v21 = vld [vmem:[%s992_s5 + $0x10] sm:$0xff]  ;;  %v488_v22 = vld [vmem:[%s992_s5 + $0x18] sm:$0xff] }
  0x1d   : > { %v669_v23 = vld [vmem:[%s271_s23] ss:$0 sm:$0xff]  ;;  %v338_v44 = vld [vmem:[%s990_s3 + $0x10] sm:$0xff]  ;;  %v337_v46 = vld [vmem:[%s990_s3 + $0x8] sm:$0xff]  ;;  %s267_s23 = sand.u32 1, %s748_s27  }
  0x1e   : > { %v336_v43 = vld [vmem:[%s990_s3] sm:$0xff]  ;;  %v339_v47 = vld [vmem:[%s990_s3 + $0x18] sm:$0xff]  ;;  %v606_v0 = vld [vmem:[%s990_s3 + $0x30] sm:$0xff]  ;;  %s268_s24 = scalar_lea.vmem [#allocation3], %s267_s23  ;;  %s532_s9 = scalar_lea.sflag [#allocation4], %s267_s23 }
  0x1f   : > { %v604_v63 = vld [vmem:[%s990_s3 + $0x20] sm:$0xff]  ;;  %v605_v2 = vld [vmem:[%s990_s3 + $0x28] sm:$0xff]  ;;  %v607_v3 = vld [vmem:[%s990_s3 + $0x38] sm:$0xff]  ;;  %s542_s25 = sshll.u32 %s268_s24, 4  ;;  %s543_s25 = int_to_ptr.vmem [resolvable:$true] %s542_s25 }
  0x20   : > { %279 = vperm.xlu2 %668, %v272_v5  }
  0x21   : > { %289 = vperm.xlu0 %666, %v274_v6   ;;  %284 = vperm.xlu1 %667, %v273_v7  }
  0x28   : > { %361 = vperm.xlu2 %668, %v343_v8  }
  0x29   : > { %315 = vperm.xlu0 %666, %v305_v9   ;;  %310 = vperm.xlu1 %667, %v304_v10  }
  0x30   : > { %346 = vperm.xlu2 %668, %v340_v11  }
  0x31   : > { %356 = vperm.xlu0 %666, %v342_v12   ;;  %351 = vperm.xlu1 %667, %v341_v13  }
  0x38   : > { %432 = vperm.xlu2 %668, %v610_v14  }
  0x39   : > { %422 = vperm.xlu0 %666, %v608_v15   ;;  %427 = vperm.xlu1 %667, %v609_v16  }
  0x40   : > { %496 = vperm.xlu2 %668, %v486_v17  }
  0x41   : > { %437 = vperm.xlu0 %666, %v611_v18   ;;  %491 = vperm.xlu1 %667, %v485_v19  }
  0x48   : > { %525 = vperm.xlu2 %668, %v522_v20  }
  0x49   : > { %501 = vperm.xlu0 %666, %v487_v21   ;;  %506 = vperm.xlu1 %667, %v488_v22  }
  0x72   : > { %v321_v28 = vpop.permute.xlu2 %320 }
  0x7a   : > { %v280_v34 = vpop.permute.xlu2 %279 }
  0x7b   : > { %v300_v35 = vmul.f32 %v669_v23, %v280_v34 }
  0x82   : > { %v362_v50 = vpop.permute.xlu2 %361 }
  0x8a   : > { %v347_v58 = vpop.permute.xlu2 %346 }
  0x8b   : > { %v326_v24 = vpop.permute.xlu1 %325  ;;  %v295_v25 = vpop.permute.xlu0 %294 }
  0x8c   : > { %v303_v26 = vmul.f32 %v669_v23, %v295_v25 }
  0x8e   : > { %v331_v27 = vadd.f32 %v326_v24, %v303_v26 }
  0x90   : > { %670 = vtanh.f32 %v331_v27 }
  0x92   : > { %v433_v9 = vpop.permute.xlu2 %432 }
  0x93   : > { %v290_v29 = vpop.permute.xlu0 %289  ;;  %v285_v30 = vpop.permute.xlu1 %284 }
  0x94   : > { %v302_v31 = vmul.f32 %v669_v23, %v290_v29  ;;  %v301_v36 = vmul.f32 %v669_v23, %v285_v30 }
  0x96   : > { %v671_v32 = vpop.eup %670  ;;  %v330_v33 = vadd.f32 %v321_v28, %v302_v31 }
  0x97   : > { %389 = vmatpush.msra.mxu0 %v671_v32  ;;  %618 = vmatpush.msra.mxu2 %v671_v32 }
  0x98   : > { %672 = vtanh.f32 %v330_v33 }
  0x9a   : > { %v497_v19 = vpop.permute.xlu2 %496 }
  0x9b   : > { %v316_v37 = vpop.permute.xlu0 %315  ;;  %v311_v38 = vpop.permute.xlu1 %310 }
  0x9c   : > { %v329_v39 = vadd.f32 %v316_v37, %v301_v36  ;;  %v328_v40 = vadd.f32 %v311_v38, %v300_v35 }
  0x9e   : > { %v673_v41 = vpop.eup %672  ;;  %674 = vtanh.f32 %v329_v39 }
  0x9f   : > { %390 = vmatpush.msra.mxu0 %v673_v41  ;;  %619 = vmatpush.msra.mxu2 %v673_v41  ;;  %676 = vtanh.f32 %v328_v40 }
  0xa2   : > { %v526_v35 = vpop.permute.xlu2 %525 }
  0xa3   : > { %v357_v51 = vpop.permute.xlu0 %356  ;;  %v352_v56 = vpop.permute.xlu1 %351  ;;  %v528_v37 = vperm.slane %v526_v35, 0 }
  0xa4   : > { %v675_v42 = vpop.eup %674 }
  0xa5   : > { %391 = vmatpush.msra.mxu0 %v675_v42  ;;  %620 = vmatpush.msra.mxu2 %v675_v42  ;;  %v677_v45 = vpop.eup %676 }
  0xa7   : > { %392 = vmatpush.msra.mxu0 %v677_v45  ;;  %621 = vmatpush.msra.mxu2 %v677_v45 }
  0xa8   : > { %600 = vmatmul.msk.f32.vlgmr.msra.gmra.mxu0 %vm364_vm0, %v336_v43  ;;  %602 = vmatmul.msk.f32.vlgmr.msra.gmra.mxu2 %vm364_vm0, %v338_v44 }
  0xab   : > { %v423_v5 = vpop.permute.xlu0 %422  ;;  %v428_v6 = vpop.permute.xlu1 %427 }
  0xb0   : > { %601 = vmatmul.msk.f32.gmra.mxu0 %vm364_vm0, %v337_v46  ;;  %603 = vmatmul.msk.f32.gmra.mxu2 %vm364_vm0, %v339_v47 }
  0xb3   : > { %v438_v13 = vpop.permute.xlu0 %437  ;;  %v492_v14 = vpop.permute.xlu1 %491 }
  0xbb   : > { %v502_v24 = vpop.permute.xlu0 %501  ;;  %v507_v27 = vpop.permute.xlu1 %506 }
 0x125   : > { %v394_v48 = vpop.f32.mrf.mxu0 }
 0x126   : > { %v395_v59 = vadd.f32 %v394_v48, %v347_v58 }
 0x12b   : > { %v400_v49 = vpop.f32.mrf.mxu2 }
 0x12c   : > { %v401_v54 = vadd.f32 %v400_v49, %v357_v51 }
 0x12d   : > { %v397_v52 = vpop.f32.mrf.mxu0 }
 0x12e   : > { %v398_v57 = vadd.f32 %v397_v52, %v352_v56 }
 0x133   : > { %v403_v53 = vpop.f32.mrf.mxu2 }
 0x134   : > { %v404_v55 = vadd.f32 %v403_v53, %v362_v50 }
 0x136   : > { %678 = vtanh.f32 %v404_v55 }
 0x137   : > { %680 = vtanh.f32 %v401_v54 }
 0x138   : > { %682 = vtanh.f32 %v398_v57 }
 0x139   : > { %684 = vtanh.f32 %v395_v59 }
 0x13c   : > { %v679_v60 = vpop.eup %678 }
 0x13d   : > { %464 = vmatpush.msra.mxu1 %v679_v60  ;;  %622 = vmatpush.msra.mxu3 %v679_v60  ;;  %v681_v61 = vpop.eup %680 }
 0x13e   : > { %v683_v62 = vpop.eup %682 }
 0x13f   : > { %465 = vmatpush.msra.mxu1 %v681_v61  ;;  %623 = vmatpush.msra.mxu3 %v681_v61  ;;  %v685_v1 = vpop.eup %684 }
 0x141   : > { %466 = vmatpush.msra.mxu1 %v683_v62  ;;  %624 = vmatpush.msra.mxu3 %v683_v62 }
 0x143   : > { %467 = vmatpush.msra.mxu1 %v685_v1  ;;  %625 = vmatpush.msra.mxu3 %v685_v1 }
 0x144   : > { %612 = vmatmul.msk.f32.vlgmr.msra.gmra.mxu1 %vm364_vm0, %v604_v63  ;;  %614 = vmatmul.msk.f32.vlgmr.msra.gmra.mxu3 %vm364_vm0, %v606_v0 }
 0x14c   : > { %613 = vmatmul.msk.f32.gmra.mxu1 %vm364_vm0, %v605_v2  ;;  %615 = vmatmul.msk.f32.gmra.mxu3 %vm364_vm0, %v607_v3 }
 0x1c1   : > { %v469_v4 = vpop.f32.mrf.mxu1 }
 0x1c2   : > { %v470_v7 = vadd.f32 %v469_v4, %v423_v5 }
 0x1c4   : > { %686 = vtanh.f32 %v470_v7 }
 0x1c7   : > { %v475_v8 = vpop.f32.mrf.mxu3 }
 0x1c8   : > { %v476_v11 = vadd.f32 %v475_v8, %v433_v9 }
 0x1c9   : > { %v472_v10 = vpop.f32.mrf.mxu1 }
 0x1ca   : > { %v473_v12 = vadd.f32 %v472_v10, %v428_v6  ;;  %v687_v16 = vpop.eup %686 }
 0x1cb   : > { %v509_v20 = vmul.f32 %v687_v16, %v492_v14 }
 0x1cc   : > { %688 = vtanh.f32 %v473_v12 }
 0x1cd   : > { %690 = vtanh.f32 %v476_v11 }
 0x1cf   : > { %v478_v15 = vpop.f32.mrf.mxu3 }
 0x1d0   : > { %v479_v17 = vadd.f32 %v478_v15, %v438_v13 }
 0x1d2   : > { %v689_v18 = vpop.eup %688  ;;  %692 = vtanh.f32 %v479_v17 }
 0x1d3   : > { %v510_v21 = vmul.f32 %v689_v18, %v497_v19  ;;  %v691_v22 = vpop.eup %690 }
 0x1d4   : > { %v511_v25 = vmul.f32 %v691_v22, %v502_v24 }
 0x1d5   : > { %v513_v23 = vadd.f32 %v510_v21, %v509_v20 }
 0x1d7   : > { %v514_v29 = vadd.f32 %v513_v23, %v511_v25 }
 0x1d8   : > { %v693_v26 = vpop.eup %692 }
 0x1d9   : > { %v512_v28 = vmul.f32 %v693_v26, %v507_v27 }
 0x1db   : > { %v515_v30 = vadd.f32 %v514_v29, %v512_v28 }
 0x1dd   : > { %v516_v31 = vrot.slane %v515_v30, 4 }
 0x1df   : > { %v517_v32 = vadd.f32 %v516_v31, %v515_v30 }
 0x1e1   : > { %v518_v33 = vrot.slane %v517_v32, 2 }
 0x1e3   : > { %v519_v34 = vadd.f32 %v518_v33, %v517_v32 }
 0x1e5   : > { %v520_v36 = vrot.slane %v519_v34, 1 }
 0x1e7   : > { %v521_v38 = vadd.f32 %v520_v36, %v519_v34 }
 0x1e9   : > { %v529_v39 = vadd.f32 %v528_v37, %v521_v38 }
 0x1eb   : > { %530 = vst [vmem:[%s268_s24] sm:$0x1] %v529_v39 }
 0x1ec   : > { %721 = shalt.err (!%p718_p3)
}
 0x1ed   : > { %626 = dma.vmem_to_hbm [thread:$0]  (%p840_p5), %s543_s25, 16, %s545_s30, %s532_s9  }
 0x1ee PF: > { %p632_p4 = scmp.ge.s32.totalorder %s756_s29, 2  ;;  %s556_s20 = sand.u32 1, %s744_s26  }
 0x1ef   : > { %s557_s23 = scalar_lea.sflag [#allocation4], %s556_s20 }
 0x1f0   : > { %p629_p7 = pnand %p632_p4, %p844_p6 }
 0x1f2   : > { %p630_p8 = pneg %p629_p7 }
 0x1f4   : > { %739 = dma.done.wait (%p630_p8), %s557_s23, 16  }
 0x1f5   : > { %741 = vsyncadd (%p630_p8), %s557_s23, 4294967280  ;;  %p19_p9 = scmp.ge.s32.totalorder %s827_s8, 5   ;;  %s997_s26 = smov %s748_s27 }
 0x1f6   : > { %s998_s27 = smov %s752_s28  ;;  %s999_s28 = smov %s838_s11 }
 0x1f7   : > { %s1000_s29 = smov %s827_s8  ;;  %21 = sbr.rel (!%p19_p9) target bundleno = 6 (0x6), region = 85 }
 0x1fc   :  { %562 = vsyncpa [#allocation4], 1 }
 0x1fd   :  { %564 = vsyncpa [#allocation4 + $0x1], 1 }

</bundles_post_ra>
